<compile_context>
chip_gen: v7x
topology: tpu7x:2x2x1
jax: 0.10.0
libtpu: 0.0.40
codegen_flags: <defaults>
</compile_context>

<pallas_src>
import jax
import jax.numpy as jnp
from jax.experimental import pallas as pl
from jax.experimental.pallas import tpu as pltpu

INPUT_DIM = 1
HIDDEN_DIM = 10
LANE = 128                 # vreg lane width
DEFAULT_TILE_ROWS = 256    # (256,128) f32 tile; x+out double-buffered ~= 0.5 MiB VMEM


def mlp_kernel(w1_ref, b1_ref, w2_ref, b2_ref, x_ref, o_ref):
    # x_ref/o_ref: (TILE_ROWS, 128) f32 VMEM slabs, batch elements on sublanes+lanes.
    # w1/b1/w2: (HIDDEN_DIM,) f32 in SMEM, b2: (1,) f32 in SMEM.
    x = x_ref[...]
    acc = jnp.zeros_like(x) + b2_ref[0]
    # Fully unrolled hidden layer: pure VPU FMAs + max, no MXU, no cross-lane XLU.
    for j in range(HIDDEN_DIM):
        h = jnp.maximum(x * w1_ref[j] + b1_ref[j], 0.0)
        acc = acc + h * w2_ref[j]
    o_ref[...] = acc


def simple_neural_network(x, w1, b1, w2, b2, *, tile_rows=DEFAULT_TILE_ROWS):
    """x: (B, 1) f32. w1: (1, HIDDEN_DIM). b1: (HIDDEN_DIM,). w2: (HIDDEN_DIM, 1).
    b2: (1,). Returns (B, 1) f32 == Linear(1,10) -> ReLU -> Linear(10,1)."""
    B = x.shape[0]

    # Lane-dense layout: flatten the batch onto a (rows, 128) slab, pad as needed.
    rows = pl.cdiv(B, LANE)
    tr = min(tile_rows, rows)
    tr = max(8, ((tr + 7) // 8) * 8)              # sublane multiple of 8
    rows_pad = ((rows + tr - 1) // tr) * tr       # whole number of tiles
    n_pad = rows_pad * LANE
    x_slab = jnp.pad(jnp.ravel(x), (0, n_pad - B)).reshape(rows_pad, LANE)

    grid = (rows_pad // tr,)

    out_slab = pl.pallas_call(
        mlp_kernel,
        out_shape=jax.ShapeDtypeStruct((rows_pad, LANE), jnp.float32),
        grid_spec=pltpu.PrefetchScalarGridSpec(
            num_scalar_prefetch=0,
            grid=grid,
            in_specs=[
                pl.BlockSpec(memory_space=pltpu.MemorySpace.SMEM),  # w1 scalars
                pl.BlockSpec(memory_space=pltpu.MemorySpace.SMEM),  # b1 scalars
                pl.BlockSpec(memory_space=pltpu.MemorySpace.SMEM),  # w2 scalars
                pl.BlockSpec(memory_space=pltpu.MemorySpace.SMEM),  # b2 scalar
                pl.BlockSpec((tr, LANE), lambda i: (i, 0)),          # x slab tile
            ],
            out_specs=pl.BlockSpec((tr, LANE), lambda i: (i, 0)),    # y slab tile
        ),
        compiler_params=pltpu.CompilerParams(
            dimension_semantics=("parallel",),   # megacore sharding on v7x
        ),
        cost_estimate=pl.CostEstimate(
            flops=50 * n_pad, transcendentals=0, bytes_accessed=8 * n_pad),
    )(
        jnp.ravel(w1).astype(jnp.float32),
        jnp.ravel(b1).astype(jnp.float32),
        jnp.ravel(w2).astype(jnp.float32),
        jnp.ravel(b2).astype(jnp.float32),
        x_slab,
    )
    # Drop padding lanes and restore PyTorch's (B, 1) output shape.
    return out_slab.reshape(-1)[:B].reshape(B, 1)


def reference_forward(x, w1, b1, w2, b2):
    h = jnp.maximum(x @ w1 + b1, 0.0)
    return h @ w2 + b2


if __name__ == "__main__":
    key = jax.random.PRNGKey(0)
    k_x, k_w1, k_b1, k_w2, k_b2 = jax.random.split(key, 5)

    batch = 8
    # PyTorch nn.Linear params stored transposed as (in, out) for the kernel.
    w1 = jax.random.uniform(k_w1, (INPUT_DIM, HIDDEN_DIM), jnp.float32, -1.0, 1.0)
    b1 = jax.random.uniform(k_b1, (HIDDEN_DIM,), jnp.float32, -1.0, 1.0)
    w2 = jax.random.uniform(k_w2, (HIDDEN_DIM, 1), jnp.float32, -0.3, 0.3)
    b2 = jax.random.uniform(k_b2, (1,), jnp.float32, -0.3, 0.3)
    x = jax.random.normal(k_x, (batch, INPUT_DIM), jnp.float32)

    out = jax.block_until_ready(simple_neural_network(x, w1, b1, w2, b2))

    ref = reference_forward(x, w1, b1.reshape(1, -1), w2, b2.reshape(1, 1))
    assert out.shape == (batch, 1)
    assert jnp.allclose(out, ref, atol=1e-5, rtol=1e-5)

    print("KERNEL_OK")
</pallas_src>

<mosaic_0001>
module attributes {stable_mosaic.version = 11 : i64} {
  func.func @mlp_kernel(%arg0: i32, %arg1: memref<10xf32, #tpu.memory_space<smem>>, %arg2: memref<10xf32, #tpu.memory_space<smem>>, %arg3: memref<10xf32, #tpu.memory_space<smem>>, %arg4: memref<1xf32, #tpu.memory_space<smem>>, %arg5: memref<8x128xf32, #tpu.memory_space<vmem>>, %arg6: memref<8x128xf32, #tpu.memory_space<vmem>>) attributes {dimension_semantics = [#tpu.dimension_semantics<parallel>], iteration_bounds = array<i64: 1>, scalar_prefetch = 0 : i64, scratch_operands = 0 : i64, tpu.core_type = #tpu.core_type<tc>, window_params = [{transform_indices = @transform_0, window_bounds = array<i64: 10>}, {transform_indices = @transform_1, window_bounds = array<i64: 10>}, {transform_indices = @transform_2, window_bounds = array<i64: 10>}, {transform_indices = @transform_3, window_bounds = array<i64: 1>}, {transform_indices = @transform_4, window_bounds = array<i64: 8, 128>}, {transform_indices = @transform_5, window_bounds = array<i64: 8, 128>}]} {
    %c0 = arith.constant 0 : index
    %c0_0 = arith.constant 0 : index
    %0 = vector.load %arg5[%c0, %c0_0] : memref<8x128xf32, #tpu.memory_space<vmem>>, vector<8x128xf32>
    %cst = arith.constant 0.000000e+00 : f32
    %1 = vector.broadcast %cst : f32 to vector<8x128xf32>
    %c0_1 = arith.constant 0 : index
    %2 = memref.load %arg4[%c0_1] : memref<1xf32, #tpu.memory_space<smem>>
    %3 = vector.broadcast %2 : f32 to vector<8x128xf32>
    %4 = arith.addf %1, %3 : vector<8x128xf32>
    %c0_2 = arith.constant 0 : index
    %5 = memref.load %arg1[%c0_2] : memref<10xf32, #tpu.memory_space<smem>>
    %6 = vector.broadcast %5 : f32 to vector<8x128xf32>
    %7 = arith.mulf %0, %6 : vector<8x128xf32>
    %c0_3 = arith.constant 0 : index
    %8 = memref.load %arg2[%c0_3] : memref<10xf32, #tpu.memory_space<smem>>
    %9 = vector.broadcast %8 : f32 to vector<8x128xf32>
    %10 = arith.addf %7, %9 : vector<8x128xf32>
    %cst_4 = arith.constant 0.000000e+00 : f32
    %11 = vector.broadcast %cst_4 : f32 to vector<8x128xf32>
    %12 = arith.maximumf %10, %11 : vector<8x128xf32>
    %c0_5 = arith.constant 0 : index
    %13 = memref.load %arg3[%c0_5] : memref<10xf32, #tpu.memory_space<smem>>
    %14 = vector.broadcast %13 : f32 to vector<8x128xf32>
    %15 = arith.mulf %12, %14 : vector<8x128xf32>
    %16 = arith.addf %4, %15 : vector<8x128xf32>
    %c1 = arith.constant 1 : index
    %17 = memref.load %arg1[%c1] : memref<10xf32, #tpu.memory_space<smem>>
    %18 = vector.broadcast %17 : f32 to vector<8x128xf32>
    %19 = arith.mulf %0, %18 : vector<8x128xf32>
    %c1_6 = arith.constant 1 : index
    %20 = memref.load %arg2[%c1_6] : memref<10xf32, #tpu.memory_space<smem>>
    %21 = vector.broadcast %20 : f32 to vector<8x128xf32>
    %22 = arith.addf %19, %21 : vector<8x128xf32>
    %cst_7 = arith.constant 0.000000e+00 : f32
    %23 = vector.broadcast %cst_7 : f32 to vector<8x128xf32>
    %24 = arith.maximumf %22, %23 : vector<8x128xf32>
    %c1_8 = arith.constant 1 : index
    %25 = memref.load %arg3[%c1_8] : memref<10xf32, #tpu.memory_space<smem>>
    %26 = vector.broadcast %25 : f32 to vector<8x128xf32>
    %27 = arith.mulf %24, %26 : vector<8x128xf32>
    %28 = arith.addf %16, %27 : vector<8x128xf32>
    %c2 = arith.constant 2 : index
    %29 = memref.load %arg1[%c2] : memref<10xf32, #tpu.memory_space<smem>>
    %30 = vector.broadcast %29 : f32 to vector<8x128xf32>
    %31 = arith.mulf %0, %30 : vector<8x128xf32>
    %c2_9 = arith.constant 2 : index
    %32 = memref.load %arg2[%c2_9] : memref<10xf32, #tpu.memory_space<smem>>
    %33 = vector.broadcast %32 : f32 to vector<8x128xf32>
    %34 = arith.addf %31, %33 : vector<8x128xf32>
    %cst_10 = arith.constant 0.000000e+00 : f32
    %35 = vector.broadcast %cst_10 : f32 to vector<8x128xf32>
    %36 = arith.maximumf %34, %35 : vector<8x128xf32>
    %c2_11 = arith.constant 2 : index
    %37 = memref.load %arg3[%c2_11] : memref<10xf32, #tpu.memory_space<smem>>
    %38 = vector.broadcast %37 : f32 to vector<8x128xf32>
    %39 = arith.mulf %36, %38 : vector<8x128xf32>
    %40 = arith.addf %28, %39 : vector<8x128xf32>
    %c3 = arith.constant 3 : index
    %41 = memref.load %arg1[%c3] : memref<10xf32, #tpu.memory_space<smem>>
    %42 = vector.broadcast %41 : f32 to vector<8x128xf32>
    %43 = arith.mulf %0, %42 : vector<8x128xf32>
    %c3_12 = arith.constant 3 : index
    %44 = memref.load %arg2[%c3_12] : memref<10xf32, #tpu.memory_space<smem>>
    %45 = vector.broadcast %44 : f32 to vector<8x128xf32>
    %46 = arith.addf %43, %45 : vector<8x128xf32>
    %cst_13 = arith.constant 0.000000e+00 : f32
    %47 = vector.broadcast %cst_13 : f32 to vector<8x128xf32>
    %48 = arith.maximumf %46, %47 : vector<8x128xf32>
    %c3_14 = arith.constant 3 : index
    %49 = memref.load %arg3[%c3_14] : memref<10xf32, #tpu.memory_space<smem>>
    %50 = vector.broadcast %49 : f32 to vector<8x128xf32>
    %51 = arith.mulf %48, %50 : vector<8x128xf32>
    %52 = arith.addf %40, %51 : vector<8x128xf32>
    %c4 = arith.constant 4 : index
    %53 = memref.load %arg1[%c4] : memref<10xf32, #tpu.memory_space<smem>>
    %54 = vector.broadcast %53 : f32 to vector<8x128xf32>
    %55 = arith.mulf %0, %54 : vector<8x128xf32>
    %c4_15 = arith.constant 4 : index
    %56 = memref.load %arg2[%c4_15] : memref<10xf32, #tpu.memory_space<smem>>
    %57 = vector.broadcast %56 : f32 to vector<8x128xf32>
    %58 = arith.addf %55, %57 : vector<8x128xf32>
    %cst_16 = arith.constant 0.000000e+00 : f32
    %59 = vector.broadcast %cst_16 : f32 to vector<8x128xf32>
    %60 = arith.maximumf %58, %59 : vector<8x128xf32>
    %c4_17 = arith.constant 4 : index
    %61 = memref.load %arg3[%c4_17] : memref<10xf32, #tpu.memory_space<smem>>
    %62 = vector.broadcast %61 : f32 to vector<8x128xf32>
    %63 = arith.mulf %60, %62 : vector<8x128xf32>
    %64 = arith.addf %52, %63 : vector<8x128xf32>
    %c5 = arith.constant 5 : index
    %65 = memref.load %arg1[%c5] : memref<10xf32, #tpu.memory_space<smem>>
    %66 = vector.broadcast %65 : f32 to vector<8x128xf32>
    %67 = arith.mulf %0, %66 : vector<8x128xf32>
    %c5_18 = arith.constant 5 : index
    %68 = memref.load %arg2[%c5_18] : memref<10xf32, #tpu.memory_space<smem>>
    %69 = vector.broadcast %68 : f32 to vector<8x128xf32>
    %70 = arith.addf %67, %69 : vector<8x128xf32>
    %cst_19 = arith.constant 0.000000e+00 : f32
    %71 = vector.broadcast %cst_19 : f32 to vector<8x128xf32>
    %72 = arith.maximumf %70, %71 : vector<8x128xf32>
    %c5_20 = arith.constant 5 : index
    %73 = memref.load %arg3[%c5_20] : memref<10xf32, #tpu.memory_space<smem>>
    %74 = vector.broadcast %73 : f32 to vector<8x128xf32>
    %75 = arith.mulf %72, %74 : vector<8x128xf32>
    %76 = arith.addf %64, %75 : vector<8x128xf32>
    %c6 = arith.constant 6 : index
    %77 = memref.load %arg1[%c6] : memref<10xf32, #tpu.memory_space<smem>>
    %78 = vector.broadcast %77 : f32 to vector<8x128xf32>
    %79 = arith.mulf %0, %78 : vector<8x128xf32>
    %c6_21 = arith.constant 6 : index
    %80 = memref.load %arg2[%c6_21] : memref<10xf32, #tpu.memory_space<smem>>
    %81 = vector.broadcast %80 : f32 to vector<8x128xf32>
    %82 = arith.addf %79, %81 : vector<8x128xf32>
    %cst_22 = arith.constant 0.000000e+00 : f32
    %83 = vector.broadcast %cst_22 : f32 to vector<8x128xf32>
    %84 = arith.maximumf %82, %83 : vector<8x128xf32>
    %c6_23 = arith.constant 6 : index
    %85 = memref.load %arg3[%c6_23] : memref<10xf32, #tpu.memory_space<smem>>
    %86 = vector.broadcast %85 : f32 to vector<8x128xf32>
    %87 = arith.mulf %84, %86 : vector<8x128xf32>
    %88 = arith.addf %76, %87 : vector<8x128xf32>
    %c7 = arith.constant 7 : index
    %89 = memref.load %arg1[%c7] : memref<10xf32, #tpu.memory_space<smem>>
    %90 = vector.broadcast %89 : f32 to vector<8x128xf32>
    %91 = arith.mulf %0, %90 : vector<8x128xf32>
    %c7_24 = arith.constant 7 : index
    %92 = memref.load %arg2[%c7_24] : memref<10xf32, #tpu.memory_space<smem>>
    %93 = vector.broadcast %92 : f32 to vector<8x128xf32>
    %94 = arith.addf %91, %93 : vector<8x128xf32>
    %cst_25 = arith.constant 0.000000e+00 : f32
    %95 = vector.broadcast %cst_25 : f32 to vector<8x128xf32>
    %96 = arith.maximumf %94, %95 : vector<8x128xf32>
    %c7_26 = arith.constant 7 : index
    %97 = memref.load %arg3[%c7_26] : memref<10xf32, #tpu.memory_space<smem>>
    %98 = vector.broadcast %97 : f32 to vector<8x128xf32>
    %99 = arith.mulf %96, %98 : vector<8x128xf32>
    %100 = arith.addf %88, %99 : vector<8x128xf32>
    %c8 = arith.constant 8 : index
    %101 = memref.load %arg1[%c8] : memref<10xf32, #tpu.memory_space<smem>>
    %102 = vector.broadcast %101 : f32 to vector<8x128xf32>
    %103 = arith.mulf %0, %102 : vector<8x128xf32>
    %c8_27 = arith.constant 8 : index
    %104 = memref.load %arg2[%c8_27] : memref<10xf32, #tpu.memory_space<smem>>
    %105 = vector.broadcast %104 : f32 to vector<8x128xf32>
    %106 = arith.addf %103, %105 : vector<8x128xf32>
    %cst_28 = arith.constant 0.000000e+00 : f32
    %107 = vector.broadcast %cst_28 : f32 to vector<8x128xf32>
    %108 = arith.maximumf %106, %107 : vector<8x128xf32>
    %c8_29 = arith.constant 8 : index
    %109 = memref.load %arg3[%c8_29] : memref<10xf32, #tpu.memory_space<smem>>
    %110 = vector.broadcast %109 : f32 to vector<8x128xf32>
    %111 = arith.mulf %108, %110 : vector<8x128xf32>
    %112 = arith.addf %100, %111 : vector<8x128xf32>
    %c9 = arith.constant 9 : index
    %113 = memref.load %arg1[%c9] : memref<10xf32, #tpu.memory_space<smem>>
    %114 = vector.broadcast %113 : f32 to vector<8x128xf32>
    %115 = arith.mulf %0, %114 : vector<8x128xf32>
    %c9_30 = arith.constant 9 : index
    %116 = memref.load %arg2[%c9_30] : memref<10xf32, #tpu.memory_space<smem>>
    %117 = vector.broadcast %116 : f32 to vector<8x128xf32>
    %118 = arith.addf %115, %117 : vector<8x128xf32>
    %cst_31 = arith.constant 0.000000e+00 : f32
    %119 = vector.broadcast %cst_31 : f32 to vector<8x128xf32>
    %120 = arith.maximumf %118, %119 : vector<8x128xf32>
    %c9_32 = arith.constant 9 : index
    %121 = memref.load %arg3[%c9_32] : memref<10xf32, #tpu.memory_space<smem>>
    %122 = vector.broadcast %121 : f32 to vector<8x128xf32>
    %123 = arith.mulf %120, %122 : vector<8x128xf32>
    %124 = arith.addf %112, %123 : vector<8x128xf32>
    %c0_33 = arith.constant 0 : index
    %c0_34 = arith.constant 0 : index
    %125 = vector.load %arg6[%c0_33, %c0_34] : memref<8x128xf32, #tpu.memory_space<vmem>>, vector<8x128xf32>
    tpu.vector_store %arg6[%c0_33, %c0_34], %124 {strides = array<i32>} : memref<8x128xf32, #tpu.memory_space<vmem>>, vector<8x128xf32>,
    return
  }
  func.func @transform_0(%arg0: i32) -> i32 {
    %c0_i32 = arith.constant 0 : i32
    %c0_i32_0 = arith.constant 0 : i32
    return %c0_i32 : i32
  }
  func.func @transform_1(%arg0: i32) -> i32 {
    %c0_i32 = arith.constant 0 : i32
    %c0_i32_0 = arith.constant 0 : i32
    return %c0_i32 : i32
  }
  func.func @transform_2(%arg0: i32) -> i32 {
    %c0_i32 = arith.constant 0 : i32
    %c0_i32_0 = arith.constant 0 : i32
    return %c0_i32 : i32
  }
  func.func @transform_3(%arg0: i32) -> i32 {
    %c0_i32 = arith.constant 0 : i32
    %c0_i32_0 = arith.constant 0 : i32
    return %c0_i32 : i32
  }
  func.func @transform_4(%arg0: i32) -> (i32, i32) {
    %c0_i32 = arith.constant 0 : i32
    %c0_i32_0 = arith.constant 0 : i32
    return %arg0, %c0_i32 : i32, i32
  }
  func.func @transform_5(%arg0: i32) -> (i32, i32) {
    %c0_i32 = arith.constant 0 : i32
    %c0_i32_0 = arith.constant 0 : i32
    return %arg0, %c0_i32 : i32, i32
  }
}

</mosaic_0001>

<bundles_post_ra>
// kernel: tpu_custom_call.1
= control target key start
LH: loop header
LB: loop body
LE: loop exit
PB: predicated region body
PF: predicated region fallthrough
CT: control target
= control target key end

     0   :  { %11 = vsyncpa [#allocation5], 0  ;;  %s429_s0 = inlined_call_operand.vmem [shape: f32[10], index: 0, kind: input, shape index: {}]   ;;  %s430_s1 = inlined_call_operand.vmem [shape: f32[10], index: 1, kind: input, shape index: {}]   ;;  %s431_s2 = inlined_call_operand.vmem [shape: f32[10], index: 2, kind: input, shape index: {}]   ;;  %s432_s3 = inlined_call_operand.<no memory space> [shape: f32[1], index: 3, kind: input, shape index: {}]   ;;  %s433_s4 = inlined_call_operand.vmem [shape: f32[8,128], index: 4, kind: input, shape index: {}]   ;;  %s434_s5 = inlined_call_operand.hbm [shape: f32[8,128], index: 5, kind: output, shape index: {}]  }
   0x1   :  { %12 = vsyncpa [#allocation7], 0  ;;  %s30_s20 = sshll.u32 %s430_s1, 4  ;;  %s31_s20 = int_to_ptr.vmem [resolvable:$true] %s30_s20 }
   0x2   :  { %13 = vsyncpa [#allocation4], 0  ;;  %s20_s23 = sshll.u32 %s429_s0, 4  ;;  %s220_s24 = scalar_lea.vmem %s31_s20, 16  ;;  %s21_s23 = int_to_ptr.vmem [resolvable:$true] %s20_s23 }
   0x3   :  { %p221_p0 = scmp.ne.s32.totalorder %s31_s20, %s220_s24  ;;  %p225_p1 = scmp.lt.s32.totalorder %s31_s20, %s31_s20 }
   0x4   :  { %p226_p2 = scmp.lt.s32.totalorder %s220_s24, %s220_s24 }
   0x6   :  { %p227_p3 = por %p226_p2, %p225_p1 }
   0x8   :  { %p228_p4 = pnand %p227_p3, %p221_p0 }
   0xa   :  { %231 = shalt.err (!%p228_p4)
}
   0xb   :  { %s284_s25 = smov [#allocation6]   ;;  %s232_s26 = scalar_lea.vmem %s21_s23, 16 }
   0xc   :  { %33 = dma.vmem_to_smem %s31_s20, 16, %s284_s25, [#allocation7]  }
   0xd   :  { %p233_p5 = scmp.ne.s32.totalorder %s21_s23, %s232_s26  ;;  %p237_p6 = scmp.lt.s32.totalorder %s21_s23, %s21_s23 }
   0xe   :  { %p238_p7 = scmp.lt.s32.totalorder %s232_s26, %s232_s26 }
  0x10   :  { %p239_p8 = por %p238_p7, %p237_p6 }
  0x12   :  { %p240_p9 = pnand %p239_p8, %p233_p5 }
  0x14   :  { %243 = shalt.err (!%p240_p9)
}
  0x15   :  { %s285_s1 = smov [#allocation3]   ;;  %s40_s28 = sshll.u32 %s431_s2, 4  ;;  %s41_s28 = int_to_ptr.vmem [resolvable:$true] %s40_s28 }
  0x16   :  { %23 = dma.vmem_to_smem %s21_s23, 16, %s285_s1, [#allocation5]  }
  0x17   :  { %s244_s29 = scalar_lea.vmem %s41_s28, 16  ;;  %p249_p11 = scmp.lt.s32.totalorder %s41_s28, %s41_s28 }
  0x18   :  { %p245_p10 = scmp.ne.s32.totalorder %s41_s28, %s244_s29  ;;  %p250_p12 = scmp.lt.s32.totalorder %s244_s29, %s244_s29 }
  0x1a   :  { %p251_p13 = por %p250_p12, %p249_p11 }
  0x1c   :  { %p252_p0 = pnand %p251_p13, %p245_p10 }
  0x1e   :  { %255 = shalt.err (!%p252_p0)
}
  0x1f   :  { %s286_s30 = smov [#allocation8]  }
  0x20   :  { %43 = dma.vmem_to_smem %s41_s28, 16, %s286_s30, [#allocation7]  }
  0x21   :  { %278 = dma.done.wait [#allocation5], 16  }
  0x22   :  { %279 = vsyncadd [#allocation5], 4294967280 }
  0x23   :  { %280 = dma.done.wait [#allocation7], 32  }
  0x24   :  { %281 = vsyncadd [#allocation7], 4294967264 }
  0x25   :  { %57 = sfence }
  0x26   :  { %s62_s6 = sld [smem:[#allocation3]]  ;;  %s189_s2 = sld [smem:[#allocation3 + $0x1]]  ;;  %v336_v0 = vld [vmem:[%s433_s4] sm:$0xff]  ;;  %v60_v5 = vstv %s432_s3 }
  0x27   :  { %s65_s7 = sld [smem:[#allocation6]]  ;;  %s190_s9 = sld [smem:[#allocation6 + $0x1]] }
  0x28   :  { %s327_s8 = sld [smem:[#allocation8]]  ;;  %s329_s10 = sld [smem:[#allocation8 + $0x1]] }
  0x29   :  { %s192_s11 = sld [smem:[#allocation3 + $0x2]]  ;;  %s195_s16 = sld [smem:[#allocation3 + $0x3]] }
  0x2a   :  { %s331_s12 = sld [smem:[#allocation6 + $0x2]]  ;;  %s340_s17 = sld [smem:[#allocation6 + $0x3]] }
  0x2b   :  { %s338_s15 = sld [smem:[#allocation8 + $0x2]]  ;;  %s342_s18 = sld [smem:[#allocation8 + $0x3]] }
  0x2c   :  { %v63_v1 = vstv %s62_s6  ;;  %s344_s19 = sld [smem:[#allocation3 + $0x4]]  ;;  %v74_v4 = vstv %s189_s2  ;;  %s349_s4 = sld [smem:[#allocation3 + $0x5]] }
  0x2d   :  { %v66_v2 = vstv %s65_s7  ;;  %s346_s20 = sld [smem:[#allocation6 + $0x4]]  ;;  %v64_v3 = vmul.f32 %v63_v1, %v336_v0  ;;  %v75_v6 = vmul.f32 %v74_v4, %v336_v0  ;;  %v77_v7 = vstv %s190_s9  ;;  %s357_s24 = sld [smem:[#allocation6 + $0x5]] }
  0x2e   :  { %s355_s23 = sld [smem:[#allocation8 + $0x4]]  ;;  %v70_v9 = vstv %s327_s8  ;;  %s361_s25 = sld [smem:[#allocation3 + $0x6]]  ;;  %v81_v13 = vstv %s329_s10 }
  0x2f   :  { %v67_v8 = vadd.f32 %v66_v2, %v64_v3  ;;  %v85_v10 = vstv %s192_s11  ;;  %s363_s26 = sld [smem:[#allocation6 + $0x6]]  ;;  %v78_v12 = vadd.f32 %v77_v7, %v75_v6  ;;  %v96_v15 = vstv %s195_s16  ;;  %s367_s3 = sld [smem:[#allocation8 + $0x5]] }
  0x30   :  { %v88_v11 = vstv %s331_s12  ;;  %v86_v14 = vmul.f32 %v85_v10, %v336_v0  ;;  %s369_s1 = sld [smem:[#allocation3 + $0x7]]  ;;  %v97_v18 = vmul.f32 %v96_v15, %v336_v0  ;;  %v99_v19 = vstv %s340_s17  ;;  %s374_s0 = sld [smem:[#allocation8 + $0x6]] }
  0x31   :  { %v68_v16 = vmax.f32 %v67_v8, 0.0  ;;  %v92_v17 = vstv %s338_s15  ;;  %s376_s27 = sld [smem:[#allocation6 + $0x7]]  ;;  %v79_v20 = vmax.f32 %v78_v12, 0.0  ;;  %s380_s28 = sld [smem:[#allocation3 + $0x8]]  ;;  %v103_v26 = vstv %s342_s18 }
  0x32   :  { %v89_v21 = vadd.f32 %v88_v11, %v86_v14  ;;  %v107_v22 = vstv %s344_s19  ;;  %s382_s29 = sld [smem:[#allocation6 + $0x8]]  ;;  %v100_v25 = vadd.f32 %v99_v19, %v97_v18  ;;  %s386_s30 = sld [smem:[#allocation8 + $0x7]]  ;;  %v118_v30 = vstv %s349_s4 }
  0x33   :  { %v110_v23 = vstv %s346_s20  ;;  %v71_v24 = vmul.f32 %v70_v9, %v68_v16  ;;  %v108_v27 = vmul.f32 %v107_v22, %v336_v0  ;;  %v82_v28 = vmul.f32 %v81_v13, %v79_v20  ;;  %s390_s6 = sld [smem:[#allocation3 + $0x9]]  ;;  %s398_s8 = sld [smem:[#allocation8 + $0x8]] }
  0x34   :  { %v90_v29 = vmax.f32 %v89_v21, 0.0  ;;  %v121_v31 = vstv %s357_s24  ;;  %s392_s7 = sld [smem:[#allocation6 + $0x9]]  ;;  %v101_v33 = vmax.f32 %v100_v25, 0.0  ;;  %v119_v35 = vmul.f32 %v118_v30, %v336_v0  ;;  %s287_s9 = smov [#allocation9]  }
  0x35   :  { %v72_v32 = vadd.f32 %v71_v24, %v60_v5  ;;  %v111_v34 = vadd.f32 %v110_v23, %v108_v27  ;;  %v114_v37 = vstv %s355_s23  ;;  %v129_v38 = vstv %s361_s25  ;;  %s404_s2 = sld [smem:[#allocation8 + $0x9]]  ;;  %s179_s10 = sshll.u32 %s287_s9, 4  ;;  %s180_s10 = int_to_ptr.vmem [resolvable:$true] %s179_s10 }
  0x36   :  { %v93_v36 = vmul.f32 %v92_v17, %v90_v29  ;;  %v132_v39 = vstv %s363_s26  ;;  %v104_v41 = vmul.f32 %v103_v26, %v101_v33  ;;  %v122_v43 = vadd.f32 %v121_v31, %v119_v35  ;;  %s256_s11 = scalar_lea.vmem %s180_s10, 128  ;;  %p261_p2 = scmp.lt.s32.totalorder %s180_s10, %s180_s10 }
  0x37   :  { %v83_v40 = vadd.f32 %v82_v28, %v72_v32  ;;  %v112_v42 = vmax.f32 %v111_v34, 0.0  ;;  %v125_v44 = vstv %s367_s3  ;;  %v130_v45 = vmul.f32 %v129_v38, %v336_v0  ;;  %p257_p1 = scmp.ne.s32.totalorder %s180_s10, %s256_s11  ;;  %p262_p3 = scmp.lt.s32.totalorder %s256_s11, %s256_s11 }
  0x38   :  { %v140_v46 = vstv %s369_s1  ;;  %v143_v47 = vstv %s376_s27  ;;  %v123_v50 = vmax.f32 %v122_v43, 0.0  ;;  %v136_v53 = vstv %s374_s0 }
  0x39   :  { %v94_v48 = vadd.f32 %v93_v36, %v83_v40  ;;  %v115_v49 = vmul.f32 %v114_v37, %v112_v42  ;;  %v141_v51 = vmul.f32 %v140_v46, %v336_v0  ;;  %v133_v52 = vadd.f32 %v132_v39, %v130_v45  ;;  %p263_p4 = por %p262_p3, %p261_p2 }
  0x3a   :  { %v151_v54 = vstv %s380_s28  ;;  %v154_v55 = vstv %s382_s29  ;;  %v126_v57 = vmul.f32 %v125_v44, %v123_v50  ;;  %v147_v61 = vstv %s386_s30 }
  0x3b   :  { %v105_v56 = vadd.f32 %v104_v41, %v94_v48  ;;  %v144_v58 = vadd.f32 %v143_v47, %v141_v51  ;;  %v152_v59 = vmul.f32 %v151_v54, %v336_v0  ;;  %v134_v60 = vmax.f32 %v133_v52, 0.0  ;;  %p264_p5 = pnand %p263_p4, %p257_p1 }
  0x3c   :  { %v162_v62 = vstv %s390_s6  ;;  %v165_v63 = vstv %s392_s7  ;;  %v158_v6 = vstv %s398_s8  ;;  %v169_v11 = vstv %s404_s2 }
  0x3d   :  { %v116_v1 = vadd.f32 %v115_v49, %v105_v56  ;;  %v145_v2 = vmax.f32 %v144_v58, 0.0  ;;  %v155_v3 = vadd.f32 %v154_v55, %v152_v59  ;;  %v163_v4 = vmul.f32 %v162_v62, %v336_v0 }
  0x3e   :  { %v137_v5 = vmul.f32 %v136_v53, %v134_v60 }
  0x3f   :  { %v127_v7 = vadd.f32 %v126_v57, %v116_v1  ;;  %v148_v8 = vmul.f32 %v147_v61, %v145_v2  ;;  %v156_v9 = vmax.f32 %v155_v3, 0.0  ;;  %v166_v10 = vadd.f32 %v165_v63, %v163_v4 }
  0x41   :  { %v138_v12 = vadd.f32 %v137_v5, %v127_v7  ;;  %v159_v13 = vmul.f32 %v158_v6, %v156_v9  ;;  %v167_v14 = vmax.f32 %v166_v10, 0.0 }
  0x43   :  { %v149_v15 = vadd.f32 %v148_v8, %v138_v12  ;;  %v170_v16 = vmul.f32 %v169_v11, %v167_v14 }
  0x45   :  { %v160_v17 = vadd.f32 %v159_v13, %v149_v15 }
  0x47   :  { %v171_v18 = vadd.f32 %v170_v16, %v160_v17 }
  0x49   :  { %172 = vst [vmem:[#allocation9] sm:$0xff] %v171_v18 }
  0x4a   :  { %267 = shalt.err (!%p264_p5)
}
  0x4b   :  { %s268_s14 = scalar_lea.hbm %s434_s5, 128 }
  0x4c   :  { %p269_p6 = scmp.ne.s32.totalorder %s434_s5, %s268_s14  ;;  %p272_p7 = scmp.lt.u32.totalorder %s268_s14, %s434_s5 }
  0x4e   :  { %p274_p8 = pnand %p272_p7, %p269_p6 }
  0x50   :  { %277 = shalt.err (!%p274_p8)
}
  0x51   :  { %182 = dma.vmem_to_hbm [thread:$0]  %s180_s10, 128, %s434_s5, [#allocation4]  }
  0x52   :  { %282 = dma.done.wait [#allocation4], 128  }
  0x53   :  { %283 = vsyncadd [#allocation4], 4294967168 }
  0x54   :  { %186 = vsyncpa [#allocation4], 1 }
  0x55   :  { %187 = vsyncpa [#allocation5], 1 }
  0x56   :  { %188 = vsyncpa [#allocation7], 1 }

</bundles_post_ra>
